<compile_context>
chip_gen: v7x
topology: tpu7x:2x2x1
jax: 0.10.0
libtpu: 0.0.40
codegen_flags: <defaults>
</compile_context>

<pallas_src>
import functools

import jax
import jax.numpy as jnp
from jax.experimental import pallas as pl
from jax.experimental.pallas import tpu as pltpu


def _round_up(n, m):
    return ((n + m - 1) // m) * m


def _pad2d(a, rows, cols):
    return jnp.pad(a, ((0, rows - a.shape[0]), (0, cols - a.shape[1])))


# ---------------------------------------------------------------------------
# Kernel
# ---------------------------------------------------------------------------
def pfn_kernel(x_ref, mask_ref,
               w0, b0, w1, b1, w2, b2,
               u0, c0, u1, c1, u2, c2, u3, c3,
               out_ref, *, bt, P):
    """One grid step: `bt` events == bt*P particle rows.

    x_ref:    (bt*P, C_in)  compute dtype (channels on lanes)
    mask_ref: (bt*P, 1)     compute dtype, already 0/1
    w*, u*:   weights (BN folded, channels zero-padded to 128), compute dtype
    b*, c*:   biases, f32 (added to the f32 MXU accumulator)
    out_ref:  (bt, 128)     f32, lane-dense; wrapper slices [:, :num_classes]
    """
    cdt = x_ref.dtype

    def dense_relu(a, w_ref, b_ref):
        z = jnp.dot(a, w_ref[...], preferred_element_type=jnp.float32) + b_ref[...]
        return jnp.maximum(z, 0.0)

    # phi: 3x per-particle dense (Conv1d k=1 == channel matmul) + folded BN + ReLU
    h = x_ref[...]                                   # (bt*P, C_in)
    h = dense_relu(h, w0, b0).astype(cdt)
    h = dense_relu(h, w1, b1).astype(cdt)
    h = dense_relu(h, w2, b2)                        # (bt*P, F) f32

    # mask.bool().float() already applied in the wrapper (0/1 in compute dtype);
    # masked per-event particle sum done fully in f32 as a sublane (XLU) reduction.
    m = mask_ref[...].astype(jnp.float32)            # (bt*P, 1)
    F = h.shape[-1]
    pooled = jnp.sum((h * m).reshape(bt, P, F), axis=1)   # (bt, F) f32

    # fc head: 3x Linear+ReLU, then final Linear (no softmax: for_inference=False)
    f = dense_relu(pooled.astype(cdt), u0, c0).astype(cdt)
    f = dense_relu(f, u1, c1).astype(cdt)
    f = dense_relu(f, u2, c2).astype(cdt)
    out_ref[...] = jnp.dot(f, u3[...], preferred_element_type=jnp.float32) + c3[...]


# ---------------------------------------------------------------------------
# Wrapper-side parameter preparation (BN folding + 128-lane padding + dtype cast)
# ---------------------------------------------------------------------------
def prepare_params(params, compute_dtype):
    """Fold eval-mode BatchNorms into the adjacent matmul weights, zero-pad channel
    dims to multiples of 128 lanes, cast weights to compute dtype (biases stay f32).
    Returns a flat list ordered to match pfn_kernel's signature."""
    def fold_bn_after(w, b, s, t):
        # (h @ w + b) * s + t  ==  h @ (w * s) + (b * s + t)
        return w * s, b * s + t

    # input BN folded into phi layer 0:  (h * in_s + in_t) @ w0 + b0
    w0 = params["pw0"] * jnp.transpose(params["in_s"])        # (C_in, C0)
    b0 = params["in_t"] @ params["pw0"] + params["pb0"]       # (1, C0)
    w0, b0 = fold_bn_after(w0, b0, params["ps0"], params["pt0"])
    w1, b1 = fold_bn_after(params["pw1"], params["pb1"], params["ps1"], params["pt1"])
    w2, b2 = fold_bn_after(params["pw2"], params["pb2"], params["ps2"], params["pt2"])

    mats = [w0, w1, w2, params["fw0"], params["fw1"], params["fw2"], params["fw3"]]
    vecs = [b0, b1, b2, params["fb0"], params["fb1"], params["fb2"], params["fb3"]]

    prep = []
    for i, (w, b) in enumerate(zip(mats, vecs)):
        rows = w.shape[0] if i == 0 else _round_up(w.shape[0], 128)   # keep C_in unpadded
        cols = _round_up(w.shape[1], 128)
        prep.append(_pad2d(w.astype(jnp.float32), rows, cols).astype(compute_dtype))
        prep.append(_pad2d(b.astype(jnp.float32), 1, cols))            # biases stay f32
    return prep


def _choose_batch_tile(B, P, target_rows, min_steps=1):
    """Events per grid step.  Aim for ~target_rows particle rows per step (MXU
    occupancy + amortized grid overhead), but pick bt = ceil(B / n_steps) rounded
    to a multiple of 8 so tiles are balanced (no mostly-padded last step).
    min_steps>=2 can be passed on v7x to keep both TensorCores busy."""
    bt_cap = max(1, target_rows // max(P, 1))
    n_steps = max(min_steps, -(-B // bt_cap))
    if n_steps <= 1:
        return B, 1                       # single step: blocks equal full array dims
    bt = _round_up(-(-B // n_steps), 8)   # balanced + sublane-dense blocks
    n_steps = -(-B // bt)
    if n_steps <= 1:
        return bt, 1
    return bt, n_steps


def pfn_forward(x, mask, params, *, compute_dtype=jnp.bfloat16,
                target_rows=4096, min_steps=1):
    """x: (B, input_dims, P) float32 (PyTorch NCL); mask: (B, 1, P). -> (B, num_classes) f32."""
    B, C, P = x.shape
    num_classes = params["fb3"].shape[-1]
    out_pad = _round_up(num_classes, 128)

    prep = prepare_params(params, compute_dtype)

    bt, n_steps = _choose_batch_tile(B, P, target_rows, min_steps)
    B_pad = n_steps * bt
    rows = bt * P
    # NOTE: at the default target_rows the per-step working set (~0.75 KiB/row plus
    # ~0.5 MiB of weights) sits far below even v5e's 16 MiB default scoped VMEM;
    # raise vmem_limit_bytes only if target_rows is pushed past ~8-16K rows.

    # layout glue: NCL -> rows ordered (event-major, particle-minor), channels on lanes
    x_t = jnp.transpose(x, (0, 2, 1))                 # (B, P, C)
    if B_pad != B:
        x_t = jnp.pad(x_t, ((0, B_pad - B), (0, 0), (0, 0)))
    x_rows = x_t.reshape(B_pad * P, C).astype(compute_dtype)

    # mask.bool().float() done here: ship a 0/1 array in the compute dtype.
    m01 = (mask.reshape(B, P) != 0).astype(compute_dtype)
    if B_pad != B:
        m01 = jnp.pad(m01, ((0, B_pad - B), (0, 0)))
    m_rows = m01.reshape(B_pad * P, 1)

    in_specs = (
        [pl.BlockSpec((rows, C), lambda b: (b, 0)),
         pl.BlockSpec((rows, 1), lambda b: (b, 0))]
        + [pl.BlockSpec(a.shape, lambda b: (0, 0)) for a in prep]   # constant-index weights
    )
    out_specs = pl.BlockSpec((bt, out_pad), lambda b: (b, 0))

    out = pl.pallas_call(
        functools.partial(pfn_kernel, bt=bt, P=P),
        out_shape=jax.ShapeDtypeStruct((B_pad, out_pad), jnp.float32),
        grid_spec=pltpu.PrefetchScalarGridSpec(
            num_scalar_prefetch=0,
            grid=(n_steps,),
            in_specs=in_specs,
            out_specs=out_specs,
        ),
        compiler_params=pltpu.CompilerParams(dimension_semantics=("parallel",)),
    )(x_rows, m_rows, *prep)
    return out[:B, :num_classes]


# ---------------------------------------------------------------------------
# Synthetic parameters + pure-JAX references
# ---------------------------------------------------------------------------
def init_params(key, input_dims, num_classes, Phi_sizes, F_sizes):
    """Deterministic synthetic parameters. BatchNorm layers are eval-mode and
    expressed as per-channel (scale, shift)."""
    params = {}
    keys = iter(jax.random.split(key, 64))

    def bn_fold(c):
        gamma = 1.0 + 0.1 * jax.random.normal(next(keys), (1, c), dtype=jnp.float32)
        beta = 0.1 * jax.random.normal(next(keys), (1, c), dtype=jnp.float32)
        mean = 0.1 * jax.random.normal(next(keys), (1, c), dtype=jnp.float32)
        var = jnp.abs(jax.random.normal(next(keys), (1, c), dtype=jnp.float32)) + 0.5
        eps = 1e-5
        scale = gamma / jnp.sqrt(var + eps)
        shift = beta - mean * scale
        return scale, shift

    def linear(cin, cout):
        w = jax.random.normal(next(keys), (cin, cout), dtype=jnp.float32) / jnp.sqrt(float(cin))
        b = 0.05 * jax.random.normal(next(keys), (1, cout), dtype=jnp.float32)
        return w, b

    params["in_s"], params["in_t"] = bn_fold(input_dims)

    cin = input_dims
    for i, cout in enumerate(Phi_sizes):
        params[f"pw{i}"], params[f"pb{i}"] = linear(cin, cout)
        params[f"ps{i}"], params[f"pt{i}"] = bn_fold(cout)
        cin = cout

    fin = Phi_sizes[-1]
    for i, fout in enumerate(F_sizes):
        params[f"fw{i}"], params[f"fb{i}"] = linear(fin, fout)
        fin = fout
    params["fw3"], params["fb3"] = linear(fin, num_classes)
    return params


def ref_forward(x, mask, params):
    """Faithful f32 (unfolded) reference of the module forward."""
    h = jnp.transpose(x, (0, 2, 1))                 # (B, P, C)
    h = h * params["in_s"] + params["in_t"]
    for i in range(3):
        z = h @ params[f"pw{i}"] + params[f"pb{i}"]
        z = z * params[f"ps{i}"] + params[f"pt{i}"]
        h = jnp.maximum(z, 0.0)
    m = (jnp.transpose(mask, (0, 2, 1)) != 0).astype(jnp.float32)   # (B, P, 1)
    pooled = jnp.sum(h * m, axis=1)                 # (B, Phi_last)
    f = pooled
    for i in range(3):
        f = jnp.maximum(f @ params[f"fw{i}"] + params[f"fb{i}"], 0.0)
    return f @ params["fw3"] + params["fb3"]


def ref_forward_prepared(x, mask, prep, compute_dtype, num_classes):
    """Precision-matched reference using the same folded/padded/cast parameters
    and the same cast points as the kernel (f32 pooling, bf16 matmul inputs)."""
    (w0, b0, w1, b1, w2, b2, u0, c0, u1, c1, u2, c2, u3, c3) = prep
    B, C, P = x.shape
    h = jnp.transpose(x, (0, 2, 1)).astype(compute_dtype)    # (B, P, C)

    def dense_relu(a, w, b):
        z = jnp.einsum("...k,kn->...n", a, w,
                       preferred_element_type=jnp.float32) + b
        return jnp.maximum(z, 0.0)

    h = dense_relu(h, w0, b0).astype(compute_dtype)
    h = dense_relu(h, w1, b1).astype(compute_dtype)
    h = dense_relu(h, w2, b2)                                # (B, P, 128) f32
    m = (mask.reshape(B, P, 1) != 0).astype(jnp.float32)
    pooled = jnp.sum(h * m, axis=1)                          # (B, 128) f32
    f = dense_relu(pooled.astype(compute_dtype), u0, c0).astype(compute_dtype)
    f = dense_relu(f, u1, c1).astype(compute_dtype)
    f = dense_relu(f, u2, c2).astype(compute_dtype)
    out = jnp.einsum("bk,kn->bn", f, u3, preferred_element_type=jnp.float32) + c3
    return out[:, :num_classes]


if __name__ == "__main__":
    B, input_dims, P = 2, 4, 16
    num_classes = 5
    Phi_sizes = (100, 100, 128)
    F_sizes = (100, 100, 100)

    key = jax.random.PRNGKey(0)
    kx, km, kp = jax.random.split(key, 3)
    x = jax.random.normal(kx, (B, input_dims, P), dtype=jnp.float32)
    mask = (jax.random.uniform(km, (B, 1, P)) > 0.3).astype(jnp.float32)
    params = init_params(kp, input_dims, num_classes, Phi_sizes, F_sizes)

    # 1) exact-semantics check: f32 compute path vs the faithful unfolded reference
    out_f32 = pfn_forward(x, mask, params, compute_dtype=jnp.float32)
    jax.block_until_ready(out_f32)
    ref = ref_forward(x, mask, params)
    assert out_f32.shape == (B, num_classes)
    assert bool(jnp.allclose(out_f32, ref, atol=1e-3, rtol=1e-3)), "f32 kernel mismatch vs reference"

    # 2) performance path: bf16 weights/activations, f32 MXU accumulation, f32 pool
    out_bf16 = pfn_forward(x, mask, params, compute_dtype=jnp.bfloat16)
    jax.block_until_ready(out_bf16)
    prep = prepare_params(params, jnp.bfloat16)
    ref_bf16 = ref_forward_prepared(x, mask, prep, jnp.bfloat16, num_classes)
    assert out_bf16.shape == (B, num_classes)
    assert bool(jnp.allclose(out_bf16, ref_bf16, atol=1e-2, rtol=1e-2)), \
        "bf16 kernel mismatch vs precision-matched reference"

    # TODO(synk): training-mode BatchNorm (batch statistics) is out of scope for
    # this inference kernel; eval-mode running stats are folded into the weights.
    print("KERNEL_OK")
</pallas_src>

<mosaic_0001>
module attributes {stable_mosaic.version = 11 : i64} {
  func.func @pfn_kernel(%arg0: i32, %arg1: memref<32x4xf32, #tpu.memory_space<vmem>>, %arg2: memref<32x1xf32, #tpu.memory_space<vmem>>, %arg3: memref<4x128xf32, #tpu.memory_space<vmem>>, %arg4: memref<1x128xf32, #tpu.memory_space<vmem>>, %arg5: memref<128x128xf32, #tpu.memory_space<vmem>>, %arg6: memref<1x128xf32, #tpu.memory_space<vmem>>, %arg7: memref<128x128xf32, #tpu.memory_space<vmem>>, %arg8: memref<1x128xf32, #tpu.memory_space<vmem>>, %arg9: memref<128x128xf32, #tpu.memory_space<vmem>>, %arg10: memref<1x128xf32, #tpu.memory_space<vmem>>, %arg11: memref<128x128xf32, #tpu.memory_space<vmem>>, %arg12: memref<1x128xf32, #tpu.memory_space<vmem>>, %arg13: memref<128x128xf32, #tpu.memory_space<vmem>>, %arg14: memref<1x128xf32, #tpu.memory_space<vmem>>, %arg15: memref<128x128xf32, #tpu.memory_space<vmem>>, %arg16: memref<1x128xf32, #tpu.memory_space<vmem>>, %arg17: memref<2x128xf32, #tpu.memory_space<vmem>>) attributes {dimension_semantics = [#tpu.dimension_semantics<parallel>], iteration_bounds = array<i64: 1>, scalar_prefetch = 0 : i64, scratch_operands = 0 : i64, tpu.core_type = #tpu.core_type<tc>, window_params = [{transform_indices = @transform_0, window_bounds = array<i64: 32, 4>}, {transform_indices = @transform_1, window_bounds = array<i64: 32, 1>}, {pipeline_mode = #tpu.pipeline_mode<synchronous>, transform_indices = @transform_2, window_bounds = array<i64: 4, 128>}, {pipeline_mode = #tpu.pipeline_mode<synchronous>, transform_indices = @transform_3, window_bounds = array<i64: 1, 128>}, {pipeline_mode = #tpu.pipeline_mode<synchronous>, transform_indices = @transform_4, window_bounds = array<i64: 128, 128>}, {pipeline_mode = #tpu.pipeline_mode<synchronous>, transform_indices = @transform_5, window_bounds = array<i64: 1, 128>}, {pipeline_mode = #tpu.pipeline_mode<synchronous>, transform_indices = @transform_6, window_bounds = array<i64: 128, 128>}, {pipeline_mode = #tpu.pipeline_mode<synchronous>, transform_indices = @transform_7, window_bounds = array<i64: 1, 128>}, {pipeline_mode = #tpu.pipeline_mode<synchronous>, transform_indices = @transform_8, window_bounds = array<i64: 128, 128>}, {pipeline_mode = #tpu.pipeline_mode<synchronous>, transform_indices = @transform_9, window_bounds = array<i64: 1, 128>}, {pipeline_mode = #tpu.pipeline_mode<synchronous>, transform_indices = @transform_10, window_bounds = array<i64: 128, 128>}, {pipeline_mode = #tpu.pipeline_mode<synchronous>, transform_indices = @transform_11, window_bounds = array<i64: 1, 128>}, {pipeline_mode = #tpu.pipeline_mode<synchronous>, transform_indices = @transform_12, window_bounds = array<i64: 128, 128>}, {pipeline_mode = #tpu.pipeline_mode<synchronous>, transform_indices = @transform_13, window_bounds = array<i64: 1, 128>}, {pipeline_mode = #tpu.pipeline_mode<synchronous>, transform_indices = @transform_14, window_bounds = array<i64: 128, 128>}, {pipeline_mode = #tpu.pipeline_mode<synchronous>, transform_indices = @transform_15, window_bounds = array<i64: 1, 128>}, {transform_indices = @transform_16, window_bounds = array<i64: 2, 128>}]} {
    %c0 = arith.constant 0 : index
    %c0_0 = arith.constant 0 : index
    %0 = vector.load %arg1[%c0, %c0_0] : memref<32x4xf32, #tpu.memory_space<vmem>>, vector<32x4xf32>
    %c0_1 = arith.constant 0 : index
    %c0_2 = arith.constant 0 : index
    %1 = vector.load %arg3[%c0_1, %c0_2] : memref<4x128xf32, #tpu.memory_space<vmem>>, vector<4x128xf32>
    %cst = arith.constant dense<0.000000e+00> : vector<32x128xf32>
    %2 = tpu.matmul %0, %1, %cst {dimension_numbers = #tpu.dot_dimension_numbers<[1], [0], [0], [1], [0, 0, 1, 1], [], []>} : vector<32x4xf32>, vector<4x128xf32>, vector<32x128xf32> -> vector<32x128xf32>
    %c0_3 = arith.constant 0 : index
    %c0_4 = arith.constant 0 : index
    %3 = vector.load %arg4[%c0_3, %c0_4] : memref<1x128xf32, #tpu.memory_space<vmem>>, vector<1x128xf32>
    %4 = vector.broadcast %3 : vector<1x128xf32> to vector<32x128xf32>
    %5 = arith.addf %2, %4 : vector<32x128xf32>
    %cst_5 = arith.constant 0.000000e+00 : f32
    %6 = vector.broadcast %cst_5 : f32 to vector<32x128xf32>
    %7 = arith.maximumf %5, %6 : vector<32x128xf32>
    %c0_6 = arith.constant 0 : index
    %c0_7 = arith.constant 0 : index
    %8 = vector.load %arg5[%c0_6, %c0_7] : memref<128x128xf32, #tpu.memory_space<vmem>>, vector<128x128xf32>
    %cst_8 = arith.constant dense<0.000000e+00> : vector<32x128xf32>
    %9 = tpu.matmul %7, %8, %cst_8 {dimension_numbers = #tpu.dot_dimension_numbers<[1], [0], [0], [1], [0, 0, 1, 1], [], []>} : vector<32x128xf32>, vector<128x128xf32>, vector<32x128xf32> -> vector<32x128xf32>
    %c0_9 = arith.constant 0 : index
    %c0_10 = arith.constant 0 : index
    %10 = vector.load %arg6[%c0_9, %c0_10] : memref<1x128xf32, #tpu.memory_space<vmem>>, vector<1x128xf32>
    %11 = vector.broadcast %10 : vector<1x128xf32> to vector<32x128xf32>
    %12 = arith.addf %9, %11 : vector<32x128xf32>
    %cst_11 = arith.constant 0.000000e+00 : f32
    %13 = vector.broadcast %cst_11 : f32 to vector<32x128xf32>
    %14 = arith.maximumf %12, %13 : vector<32x128xf32>
    %c0_12 = arith.constant 0 : index
    %c0_13 = arith.constant 0 : index
    %15 = vector.load %arg7[%c0_12, %c0_13] : memref<128x128xf32, #tpu.memory_space<vmem>>, vector<128x128xf32>
    %cst_14 = arith.constant dense<0.000000e+00> : vector<32x128xf32>
    %16 = tpu.matmul %14, %15, %cst_14 {dimension_numbers = #tpu.dot_dimension_numbers<[1], [0], [0], [1], [0, 0, 1, 1], [], []>} : vector<32x128xf32>, vector<128x128xf32>, vector<32x128xf32> -> vector<32x128xf32>
    %c0_15 = arith.constant 0 : index
    %c0_16 = arith.constant 0 : index
    %17 = vector.load %arg8[%c0_15, %c0_16] : memref<1x128xf32, #tpu.memory_space<vmem>>, vector<1x128xf32>
    %18 = vector.broadcast %17 : vector<1x128xf32> to vector<32x128xf32>
    %19 = arith.addf %16, %18 : vector<32x128xf32>
    %cst_17 = arith.constant 0.000000e+00 : f32
    %20 = vector.broadcast %cst_17 : f32 to vector<32x128xf32>
    %21 = arith.maximumf %19, %20 : vector<32x128xf32>
    %c0_18 = arith.constant 0 : index
    %c0_19 = arith.constant 0 : index
    %22 = vector.load %arg2[%c0_18, %c0_19] : memref<32x1xf32, #tpu.memory_space<vmem>>, vector<32x1xf32>
    %23 = vector.broadcast %22 : vector<32x1xf32> to vector<32x128xf32>
    %24 = arith.mulf %21, %23 : vector<32x128xf32>
    %25 = vector.shape_cast %24 : vector<32x128xf32> to vector<2x16x128xf32>
    %cst_20 = arith.constant dense<0.000000e+00> : vector<2x128xf32>
    %26 = vector.multi_reduction <add>, %25, %cst_20 [1] : vector<2x16x128xf32> to vector<2x128xf32>
    %c0_21 = arith.constant 0 : index
    %c0_22 = arith.constant 0 : index
    %27 = vector.load %arg9[%c0_21, %c0_22] : memref<128x128xf32, #tpu.memory_space<vmem>>, vector<128x128xf32>
    %cst_23 = arith.constant dense<0.000000e+00> : vector<2x128xf32>
    %28 = tpu.matmul %26, %27, %cst_23 {dimension_numbers = #tpu.dot_dimension_numbers<[1], [0], [0], [1], [0, 0, 1, 1], [], []>} : vector<2x128xf32>, vector<128x128xf32>, vector<2x128xf32> -> vector<2x128xf32>
    %c0_24 = arith.constant 0 : index
    %c0_25 = arith.constant 0 : index
    %29 = vector.load %arg10[%c0_24, %c0_25] : memref<1x128xf32, #tpu.memory_space<vmem>>, vector<1x128xf32>
    %30 = vector.broadcast %29 : vector<1x128xf32> to vector<2x128xf32>
    %31 = arith.addf %28, %30 : vector<2x128xf32>
    %cst_26 = arith.constant 0.000000e+00 : f32
    %32 = vector.broadcast %cst_26 : f32 to vector<2x128xf32>
    %33 = arith.maximumf %31, %32 : vector<2x128xf32>
    %c0_27 = arith.constant 0 : index
    %c0_28 = arith.constant 0 : index
    %34 = vector.load %arg11[%c0_27, %c0_28] : memref<128x128xf32, #tpu.memory_space<vmem>>, vector<128x128xf32>
    %cst_29 = arith.constant dense<0.000000e+00> : vector<2x128xf32>
    %35 = tpu.matmul %33, %34, %cst_29 {dimension_numbers = #tpu.dot_dimension_numbers<[1], [0], [0], [1], [0, 0, 1, 1], [], []>} : vector<2x128xf32>, vector<128x128xf32>, vector<2x128xf32> -> vector<2x128xf32>
    %c0_30 = arith.constant 0 : index
    %c0_31 = arith.constant 0 : index
    %36 = vector.load %arg12[%c0_30, %c0_31] : memref<1x128xf32, #tpu.memory_space<vmem>>, vector<1x128xf32>
    %37 = vector.broadcast %36 : vector<1x128xf32> to vector<2x128xf32>
    %38 = arith.addf %35, %37 : vector<2x128xf32>
    %cst_32 = arith.constant 0.000000e+00 : f32
    %39 = vector.broadcast %cst_32 : f32 to vector<2x128xf32>
    %40 = arith.maximumf %38, %39 : vector<2x128xf32>
    %c0_33 = arith.constant 0 : index
    %c0_34 = arith.constant 0 : index
    %41 = vector.load %arg13[%c0_33, %c0_34] : memref<128x128xf32, #tpu.memory_space<vmem>>, vector<128x128xf32>
    %cst_35 = arith.constant dense<0.000000e+00> : vector<2x128xf32>
    %42 = tpu.matmul %40, %41, %cst_35 {dimension_numbers = #tpu.dot_dimension_numbers<[1], [0], [0], [1], [0, 0, 1, 1], [], []>} : vector<2x128xf32>, vector<128x128xf32>, vector<2x128xf32> -> vector<2x128xf32>
    %c0_36 = arith.constant 0 : index
    %c0_37 = arith.constant 0 : index
    %43 = vector.load %arg14[%c0_36, %c0_37] : memref<1x128xf32, #tpu.memory_space<vmem>>, vector<1x128xf32>
    %44 = vector.broadcast %43 : vector<1x128xf32> to vector<2x128xf32>
    %45 = arith.addf %42, %44 : vector<2x128xf32>
    %cst_38 = arith.constant 0.000000e+00 : f32
    %46 = vector.broadcast %cst_38 : f32 to vector<2x128xf32>
    %47 = arith.maximumf %45, %46 : vector<2x128xf32>
    %c0_39 = arith.constant 0 : index
    %c0_40 = arith.constant 0 : index
    %48 = vector.load %arg15[%c0_39, %c0_40] : memref<128x128xf32, #tpu.memory_space<vmem>>, vector<128x128xf32>
    %cst_41 = arith.constant dense<0.000000e+00> : vector<2x128xf32>
    %49 = tpu.matmul %47, %48, %cst_41 {dimension_numbers = #tpu.dot_dimension_numbers<[1], [0], [0], [1], [0, 0, 1, 1], [], []>} : vector<2x128xf32>, vector<128x128xf32>, vector<2x128xf32> -> vector<2x128xf32>
    %c0_42 = arith.constant 0 : index
    %c0_43 = arith.constant 0 : index
    %50 = vector.load %arg16[%c0_42, %c0_43] : memref<1x128xf32, #tpu.memory_space<vmem>>, vector<1x128xf32>
    %51 = vector.broadcast %50 : vector<1x128xf32> to vector<2x128xf32>
    %52 = arith.addf %49, %51 : vector<2x128xf32>
    %c0_44 = arith.constant 0 : index
    %c0_45 = arith.constant 0 : index
    %53 = vector.load %arg17[%c0_44, %c0_45] : memref<2x128xf32, #tpu.memory_space<vmem>>, vector<2x128xf32>
    tpu.vector_store %arg17[%c0_44, %c0_45], %52 {strides = array<i32>} : memref<2x128xf32, #tpu.memory_space<vmem>>, vector<2x128xf32>,
    return
  }
  func.func @transform_0(%arg0: i32) -> (i32, i32) {
    %c0_i32 = arith.constant 0 : i32
    %c0_i32_0 = arith.constant 0 : i32
    return %arg0, %c0_i32 : i32, i32
  }
  func.func @transform_1(%arg0: i32) -> (i32, i32) {
    %c0_i32 = arith.constant 0 : i32
    %c0_i32_0 = arith.constant 0 : i32
    return %arg0, %c0_i32 : i32, i32
  }
  func.func @transform_2(%arg0: i32) -> (i32, i32) {
    %c0_i32 = arith.constant 0 : i32
    %c0_i32_0 = arith.constant 0 : i32
    %c0_i32_1 = arith.constant 0 : i32
    return %c0_i32, %c0_i32_0 : i32, i32
  }
  func.func @transform_3(%arg0: i32) -> (i32, i32) {
    %c0_i32 = arith.constant 0 : i32
    %c0_i32_0 = arith.constant 0 : i32
    %c0_i32_1 = arith.constant 0 : i32
    return %c0_i32, %c0_i32_0 : i32, i32
  }
  func.func @transform_4(%arg0: i32) -> (i32, i32) {
    %c0_i32 = arith.constant 0 : i32
    %c0_i32_0 = arith.constant 0 : i32
    %c0_i32_1 = arith.constant 0 : i32
    return %c0_i32, %c0_i32_0 : i32, i32
  }
  func.func @transform_5(%arg0: i32) -> (i32, i32) {
    %c0_i32 = arith.constant 0 : i32
    %c0_i32_0 = arith.constant 0 : i32
    %c0_i32_1 = arith.constant 0 : i32
    return %c0_i32, %c0_i32_0 : i32, i32
  }
  func.func @transform_6(%arg0: i32) -> (i32, i32) {
    %c0_i32 = arith.constant 0 : i32
    %c0_i32_0 = arith.constant 0 : i32
    %c0_i32_1 = arith.constant 0 : i32
    return %c0_i32, %c0_i32_0 : i32, i32
  }
  func.func @transform_7(%arg0: i32) -> (i32, i32) {
    %c0_i32 = arith.constant 0 : i32
    %c0_i32_0 = arith.constant 0 : i32
    %c0_i32_1 = arith.constant 0 : i32
    return %c0_i32, %c0_i32_0 : i32, i32
  }
  func.func @transform_8(%arg0: i32) -> (i32, i32) {
    %c0_i32 = arith.constant 0 : i32
    %c0_i32_0 = arith.constant 0 : i32
    %c0_i32_1 = arith.constant 0 : i32
    return %c0_i32, %c0_i32_0 : i32, i32
  }
  func.func @transform_9(%arg0: i32) -> (i32, i32) {
    %c0_i32 = arith.constant 0 : i32
    %c0_i32_0 = arith.constant 0 : i32
    %c0_i32_1 = arith.constant 0 : i32
    return %c0_i32, %c0_i32_0 : i32, i32
  }
  func.func @transform_10(%arg0: i32) -> (i32, i32) {
    %c0_i32 = arith.constant 0 : i32
    %c0_i32_0 = arith.constant 0 : i32
    %c0_i32_1 = arith.constant 0 : i32
    return %c0_i32, %c0_i32_0 : i32, i32
  }
  func.func @transform_11(%arg0: i32) -> (i32, i32) {
    %c0_i32 = arith.constant 0 : i32
    %c0_i32_0 = arith.constant 0 : i32
    %c0_i32_1 = arith.constant 0 : i32
    return %c0_i32, %c0_i32_0 : i32, i32
  }
  func.func @transform_12(%arg0: i32) -> (i32, i32) {
    %c0_i32 = arith.constant 0 : i32
    %c0_i32_0 = arith.constant 0 : i32
    %c0_i32_1 = arith.constant 0 : i32
    return %c0_i32, %c0_i32_0 : i32, i32
  }
  func.func @transform_13(%arg0: i32) -> (i32, i32) {
    %c0_i32 = arith.constant 0 : i32
    %c0_i32_0 = arith.constant 0 : i32
    %c0_i32_1 = arith.constant 0 : i32
    return %c0_i32, %c0_i32_0 : i32, i32
  }
  func.func @transform_14(%arg0: i32) -> (i32, i32) {
    %c0_i32 = arith.constant 0 : i32
    %c0_i32_0 = arith.constant 0 : i32
    %c0_i32_1 = arith.constant 0 : i32
    return %c0_i32, %c0_i32_0 : i32, i32
  }
  func.func @transform_15(%arg0: i32) -> (i32, i32) {
    %c0_i32 = arith.constant 0 : i32
    %c0_i32_0 = arith.constant 0 : i32
    %c0_i32_1 = arith.constant 0 : i32
    return %c0_i32, %c0_i32_0 : i32, i32
  }
  func.func @transform_16(%arg0: i32) -> (i32, i32) {
    %c0_i32 = arith.constant 0 : i32
    %c0_i32_0 = arith.constant 0 : i32
    return %arg0, %c0_i32 : i32, i32
  }
}

</mosaic_0001>

<bundles_post_ra>
// kernel: tpu_custom_call.1
= control target key start
LH: loop header
LB: loop body
LE: loop exit
PB: predicated region body
PF: predicated region fallthrough
CT: control target
= control target key end

     0   :  { %s1920_s0 = inlined_call_operand.vmem [shape: f32[32,4], index: 0, kind: input, shape index: {}]   ;;  %s1921_s1 = inlined_call_operand.vmem [shape: f32[32,1], index: 1, kind: input, shape index: {}]   ;;  %s1922_s2 = inlined_call_operand.vmem [shape: f32[4,128], index: 2, kind: input, shape index: {}]   ;;  %s1923_s3 = inlined_call_operand.vmem [shape: f32[1,128], index: 3, kind: input, shape index: {}]   ;;  %s1924_s4 = inlined_call_operand.hbm [shape: f32[128,128], index: 4, kind: input, shape index: {}]   ;;  %s1925_s5 = inlined_call_operand.vmem [shape: f32[1,128], index: 5, kind: input, shape index: {}]   ;;  %s1926_s6 = inlined_call_operand.hbm [shape: f32[128,128], index: 6, kind: input, shape index: {}]   ;;  %s1927_s7 = inlined_call_operand.vmem [shape: f32[1,128], index: 7, kind: input, shape index: {}]   ;;  %s1928_s8 = inlined_call_operand.hbm [shape: f32[128,128], index: 8, kind: input, shape index: {}]   ;;  %s1929_s9 = inlined_call_operand.vmem [shape: f32[1,128], index: 9, kind: input, shape index: {}]   ;;  %s1930_s10 = inlined_call_operand.hbm [shape: f32[128,128], index: 10, kind: input, shape index: {}]   ;;  %s1931_s11 = inlined_call_operand.vmem [shape: f32[1,128], index: 11, kind: input, shape index: {}]   ;;  %s1932_s12 = inlined_call_operand.hbm [shape: f32[128,128], index: 12, kind: input, shape index: {}]   ;;  %s1933_s13 = inlined_call_operand.vmem [shape: f32[1,128], index: 13, kind: input, shape index: {}]   ;;  %s1934_s14 = inlined_call_operand.hbm [shape: f32[128,128], index: 14, kind: input, shape index: {}]   ;;  %s1935_s15 = inlined_call_operand.vmem [shape: f32[1,128], index: 15, kind: input, shape index: {}]   ;;  %s1936_s16 = inlined_call_operand.hbm [shape: f32[2,128], index: 16, kind: output, shape index: {}]  }
   0x1   :  { %1938 = sst [smem:[#allocation19_spill]] %s1920_s0 }
   0x2   :  { %21 = vsyncpa [#allocation3], 0 }
   0x3   :  { %22 = vsyncpa [#allocation6], 0 }
   0x4   :  { %23 = vsyncpa [#allocation9], 0 }
   0x5   :  { %24 = vsyncpa [#allocation12], 0 }
   0x6   :  { %25 = vsyncpa [#allocation4], 0  ;;  %s1607_s21 = smov [#allocation5]   ;;  %s1608_s23 = smov [#allocation8]  }
   0x7   :  { %s53_s22 = sshll.u32 %s1607_s21, 4  ;;  %s81_s24 = sshll.u32 %s1608_s23, 4  ;;  %s54_s22 = int_to_ptr.vmem [resolvable:$true] %s53_s22  ;;  %s1705_s24 = int_to_ptr.vmem [resolvable:$true] %s81_s24 }
   0x8   :  { %s1443_s27 = scalar_lea.hbm %s1926_s6, 2048 }
   0x9   :  { %p1444_p0 = scmp.ne.s32.totalorder %s1926_s6, %s1443_s27  ;;  %p1447_p1 = scmp.lt.u32.totalorder %s1443_s27, %s1926_s6 }
   0xb   :  { %p1449_p2 = pnand %p1447_p1, %p1444_p0 }
   0xd   :  { %1452 = shalt.err (!%p1449_p2)
}
   0xe   :  { %s1453_s17 = scalar_lea.vmem %s54_s22, 2048  ;;  %p1458_p4 = scmp.lt.s32.totalorder %s54_s22, %s54_s22 }
   0xf   :  { %p1454_p3 = scmp.ne.s32.totalorder %s54_s22, %s1453_s17  ;;  %p1459_p5 = scmp.lt.s32.totalorder %s1453_s17, %s1453_s17 }
  0x11   :  { %p1460_p6 = por %p1459_p5, %p1458_p4 }
  0x13   :  { %p1461_p7 = pnand %p1460_p6, %p1454_p3 }
  0x15   :  { %1464 = shalt.err (!%p1461_p7)
}
  0x16   :  { %s1609_s18 = smov 128   ;;  %s1610_s19 = smov 8  }
  0x17   :  { %59 = dma.hbm_to_vmem [thread:$0]  %s1926_s6, 2048, %s54_s22, [#allocation6], %s1609_s18, %s1609_s18, %s1610_s19  }
  0x18   :  { %s1465_s26 = scalar_lea.hbm %s1930_s10, 2048 }
  0x19   :  { %p1466_p8 = scmp.ne.s32.totalorder %s1930_s10, %s1465_s26  ;;  %p1469_p9 = scmp.lt.u32.totalorder %s1465_s26, %s1930_s10 }
  0x1b   :  { %p1471_p10 = pnand %p1469_p9, %p1466_p8 }
  0x1d   :  { %1474 = shalt.err (!%p1471_p10)
}
  0x1e   :  { %s1475_s0 = scalar_lea.vmem %s1705_s24, 2048  ;;  %p1480_p12 = scmp.lt.s32.totalorder %s1705_s24, %s1705_s24 }
  0x1f   :  { %p1476_p11 = scmp.ne.s32.totalorder %s1705_s24, %s1475_s0  ;;  %p1481_p13 = scmp.lt.s32.totalorder %s1475_s0, %s1475_s0 }
  0x21   :  { %p1482_p0 = por %p1481_p13, %p1480_p12 }
  0x23   :  { %p1483_p1 = pnand %p1482_p0, %p1476_p11 }
  0x25   :  { %1486 = shalt.err (!%p1483_p1)
}
  0x26   :  { %87 = dma.hbm_to_vmem [thread:$0]  %s1930_s10, 2048, %s1705_s24, [#allocation9], %s1609_s18, %s1609_s18, %s1610_s19  }
  0x27   :  { %s1611_s17 = smov [#allocation2]   ;;  %s1612_s21 = smov [#allocation7]  }
  0x28   :  { %s39_s20 = sshll.u32 %s1611_s17, 4  ;;  %s67_s23 = sshll.u32 %s1612_s21, 4  ;;  %s40_s20 = int_to_ptr.vmem [resolvable:$true] %s39_s20  ;;  %s1742_s23 = int_to_ptr.vmem [resolvable:$true] %s67_s23 }
  0x29   :  { %s1487_s27 = scalar_lea.hbm %s1924_s4, 2048 }
  0x2a   :  { %p1488_p2 = scmp.ne.s32.totalorder %s1924_s4, %s1487_s27  ;;  %p1491_p3 = scmp.lt.u32.totalorder %s1487_s27, %s1924_s4 }
  0x2c   :  { %p1493_p4 = pnand %p1491_p3, %p1488_p2 }
  0x2e   :  { %1496 = shalt.err (!%p1493_p4)
}
  0x2f   :  { %s1497_s10 = scalar_lea.vmem %s40_s20, 2048  ;;  %p1502_p6 = scmp.lt.s32.totalorder %s40_s20, %s40_s20 }
  0x30   :  { %p1498_p5 = scmp.ne.s32.totalorder %s40_s20, %s1497_s10  ;;  %p1503_p7 = scmp.lt.s32.totalorder %s1497_s10, %s1497_s10 }
  0x32   :  { %p1504_p8 = por %p1503_p7, %p1502_p6 }
  0x34   :  { %p1505_p9 = pnand %p1504_p8, %p1498_p5 }
  0x36   :  { %1508 = shalt.err (!%p1505_p9)
}
  0x37   :  { %45 = dma.hbm_to_vmem [thread:$0]  %s1924_s4, 2048, %s40_s20, [#allocation3], %s1609_s18, %s1609_s18, %s1610_s19  }
  0x38   :  { %s1509_s21 = scalar_lea.hbm %s1928_s8, 2048 }
  0x39   :  { %p1510_p10 = scmp.ne.s32.totalorder %s1928_s8, %s1509_s21  ;;  %p1513_p11 = scmp.lt.u32.totalorder %s1509_s21, %s1928_s8 }
  0x3b   :  { %p1515_p12 = pnand %p1513_p11, %p1510_p10 }
  0x3d   :  { %1518 = shalt.err (!%p1515_p12)
}
  0x3e   :  { %s1519_s29 = scalar_lea.vmem %s1742_s23, 2048  ;;  %p1524_p0 = scmp.lt.s32.totalorder %s1742_s23, %s1742_s23 }
  0x3f   :  { %p1520_p13 = scmp.ne.s32.totalorder %s1742_s23, %s1519_s29  ;;  %p1525_p1 = scmp.lt.s32.totalorder %s1519_s29, %s1519_s29 }
  0x41   :  { %p1526_p2 = por %p1525_p1, %p1524_p0 }
  0x43   :  { %p1527_p3 = pnand %p1526_p2, %p1520_p13 }
  0x45   :  { %1530 = shalt.err (!%p1527_p3)
}
  0x46   :  { %73 = dma.hbm_to_vmem [thread:$0]  %s1928_s8, 2048, %s1742_s23, [#allocation6], %s1609_s18, %s1609_s18, %s1610_s19  }
  0x47   :  { %s1613_s30 = smov [#allocation10]   ;;  %s1614_s10 = smov [#allocation11]  }
  0x48   :  { %s95_s0 = sshll.u32 %s1613_s30, 4  ;;  %s109_s24 = sshll.u32 %s1614_s10, 4  ;;  %s96_s0 = int_to_ptr.vmem [resolvable:$true] %s95_s0  ;;  %s1779_s24 = int_to_ptr.vmem [resolvable:$true] %s109_s24 }
  0x49   :  { %s1531_s17 = scalar_lea.hbm %s1932_s12, 2048 }
  0x4a   :  { %p1532_p4 = scmp.ne.s32.totalorder %s1932_s12, %s1531_s17  ;;  %p1535_p5 = scmp.lt.u32.totalorder %s1531_s17, %s1932_s12 }
  0x4c   :  { %p1537_p6 = pnand %p1535_p5, %p1532_p4 }
  0x4e   :  { %1540 = shalt.err (!%p1537_p6)
}
  0x4f   :  { %s1541_s8 = scalar_lea.vmem %s96_s0, 2048  ;;  %p1546_p8 = scmp.lt.s32.totalorder %s96_s0, %s96_s0 }
  0x50   :  { %p1542_p7 = scmp.ne.s32.totalorder %s96_s0, %s1541_s8  ;;  %p1547_p9 = scmp.lt.s32.totalorder %s1541_s8, %s1541_s8 }
  0x52   :  { %p1548_p10 = por %p1547_p9, %p1546_p8 }
  0x54   :  { %p1549_p11 = pnand %p1548_p10, %p1542_p7 }
  0x56   :  { %1552 = shalt.err (!%p1549_p11)
}
  0x57   :  { %101 = dma.hbm_to_vmem [thread:$0]  %s1932_s12, 2048, %s96_s0, [#allocation9], %s1609_s18, %s1609_s18, %s1610_s19  }
  0x58   :  { %s1553_s20 = scalar_lea.hbm %s1934_s14, 2048 }
  0x59   :  { %p1554_p12 = scmp.ne.s32.totalorder %s1934_s14, %s1553_s20  ;;  %p1557_p13 = scmp.lt.u32.totalorder %s1553_s20, %s1934_s14 }
  0x5b   :  { %p1559_p0 = pnand %p1557_p13, %p1554_p12 }
  0x5d   :  { %1562 = shalt.err (!%p1559_p0)
}
  0x5e   :  { %s1563_s17 = scalar_lea.vmem %s1779_s24, 2048  ;;  %p1568_p2 = scmp.lt.s32.totalorder %s1779_s24, %s1779_s24 }
  0x5f   :  { %p1564_p1 = scmp.ne.s32.totalorder %s1779_s24, %s1563_s17  ;;  %p1569_p3 = scmp.lt.s32.totalorder %s1563_s17, %s1563_s17 }
  0x61   :  { %p1570_p4 = por %p1569_p3, %p1568_p2 }
  0x63   :  { %p1571_p5 = pnand %p1570_p4, %p1564_p1 }
  0x65   :  { %1574 = shalt.err (!%p1571_p5)
}
  0x66   :  { %115 = dma.hbm_to_vmem [thread:$0]  %s1934_s14, 2048, %s1779_s24, [#allocation12], %s1609_s18, %s1609_s18, %s1610_s19  }
  0x67   :  { %1597 = dma.done.wait [#allocation3], 2048  }
  0x68   :  { %1598 = vsyncadd [#allocation3], 4294965248 }
  0x69   :  { %1599 = dma.done.wait [#allocation6], 4096  }
  0x6a   :  { %1600 = vsyncadd [#allocation6], 4294963200 }
  0x6b   :  { %1601 = dma.done.wait [#allocation9], 4096  }
  0x6c   :  { %1602 = vsyncadd [#allocation9], 4294963200 }
  0x6d   :  { %1603 = dma.done.wait [#allocation12], 2048  }
  0x6e   :  { %1604 = vsyncadd [#allocation12], 4294965248  ;;  %vm161_vm0 = vcmask 1043456   ;;  %vm148_vm1 = vcmask 31744   ;;  %v140_v0 = vld [vmem:[%s1922_s2] sm:$0xf] }
  0x6f   :  { %s1939_s8 = sld [smem:[#allocation19_spill]]  ;;  %1044 = vmatprep.subr.msk.mxu0 %vm161_vm0, %v140_v0  ;;  %v254_v4 = vld [vmem:[#allocation2] sm:$0xff]  ;;  %v255_v5 = vld [vmem:[#allocation2 + $0x8] sm:$0xff]  ;;  %v256_v6 = vld [vmem:[#allocation2 + $0x10] sm:$0xff]  ;;  %vm1617_vm2 = vmmov 0   ;;  %vm545_vm3 = vcmask 1041409  }
  0x70   :  { %1045 = vmatpush3.msk.msra.mxu0 %vm161_vm0, %v140_v0  ;;  %v257_v7 = vld [vmem:[#allocation2 + $0x18] sm:$0xff]  ;;  %v1268_v8 = vpack.c.bf16 %v255_v5, %v254_v4  ;;  %v258_v11 = vld [vmem:[#allocation2 + $0x20] sm:$0xff]  ;;  %v259_v12 = vld [vmem:[#allocation2 + $0x28] sm:$0xff]  ;;  %v1615_v4 = vmov 0   ;;  %s1619_s23 = smov [#allocation13]  }
  0x71   :  { %v1272_v9 = vpack.c.bf16 %v257_v7, %v256_v6  ;;  %v1276_v13 = vpack.c.bf16 %v259_v12, %v258_v11  ;;  %v260_v14 = vld [vmem:[#allocation2 + $0x30] sm:$0xff]  ;;  %v261_v15 = vld [vmem:[#allocation2 + $0x38] sm:$0xff]  ;;  %v262_v17 = vld [vmem:[#allocation2 + $0x40] sm:$0xff]  ;;  %1441 = vset.pattern.permute.xlu0 %v1615_v4  ;;  %1442 = vset.pattern.permute.xlu1 %v1615_v4  ;;  %s907_s14 = sshll.u32 %s1619_s23, 4  ;;  %s908_s14 = int_to_ptr.vmem [resolvable:$true] %s907_s14 }
  0x72   :  { %1269 = vmatprep.subr.bf16.mxu1 %v1268_v8  ;;  %v1280_v16 = vpack.c.bf16 %v261_v15, %v260_v14  ;;  %v263_v18 = vld [vmem:[#allocation2 + $0x48] sm:$0xff]  ;;  %v264_v20 = vld [vmem:[#allocation2 + $0x50] sm:$0xff]  ;;  %v265_v21 = vld [vmem:[#allocation2 + $0x58] sm:$0xff]  ;;  %s1575_s18 = scalar_lea.vmem %s908_s14, 32  ;;  %p1580_p7 = scmp.lt.s32.totalorder %s908_s14, %s908_s14 }
  0x73   :  { %1271 = vmatpush3.bf16.msra.mxu1 %v1268_v8  ;;  %v1284_v19 = vpack.c.bf16 %v263_v18, %v262_v17  ;;  %v1288_v22 = vpack.c.bf16 %v265_v21, %v264_v20  ;;  %v266_v23 = vld [vmem:[#allocation2 + $0x60] sm:$0xff]  ;;  %v267_v24 = vld [vmem:[#allocation2 + $0x68] sm:$0xff]  ;;  %v268_v26 = vld [vmem:[#allocation2 + $0x70] sm:$0xff]  ;;  %p1576_p6 = scmp.ne.s32.totalorder %s908_s14, %s1575_s18  ;;  %p1581_p8 = scmp.lt.s32.totalorder %s1575_s18, %s1575_s18 }
  0x74   :  { %1273 = vmatprep.subr.bf16.mxu1 %v1272_v9  ;;  %v1292_v25 = vpack.c.bf16 %v267_v24, %v266_v23  ;;  %v269_v27 = vld [vmem:[#allocation2 + $0x78] sm:$0xff]  ;;  %v366_v29 = vld [vmem:[#allocation5] sm:$0xff]  ;;  %v367_v30 = vld [vmem:[#allocation5 + $0x8] sm:$0xff] }
  0x75   :  { %v136_v1 = vld [vmem:[%s1939_s8] sm:$0xff]  ;;  %v137_v2 = vld [vmem:[%s1939_s8 + $0x8] sm:$0xff]  ;;  %v138_v3 = vld [vmem:[%s1939_s8 + $0x10] sm:$0xff]  ;;  %v1296_v28 = vpack.c.bf16 %v269_v27, %v268_v26  ;;  %v1300_v32 = vpack.c.bf16 %v367_v30, %v366_v29  ;;  %p1582_p9 = por %p1581_p8, %p1580_p7 }
  0x76   :  { %1046 = vmatprep.mubr.msk.f32.mxu0 %vm148_vm1, %v136_v1  ;;  %v139_v10 = vld [vmem:[%s1939_s8 + $0x18] sm:$0xff]  ;;  %v368_v31 = vld [vmem:[#allocation5 + $0x10] sm:$0xff]  ;;  %v370_v35 = vld [vmem:[#allocation5 + $0x20] sm:$0xff] }
  0x77   :  { %1047 = vmatmul.mubr.msk.f32.vlgmr.msra.gmra.mrb[0].mxu0 %vm148_vm1, %v137_v2  ;;  %1275 = vmatpush3.bf16.msra.mxu1 %v1272_v9  ;;  %v369_v33 = vld [vmem:[#allocation5 + $0x18] sm:$0xff]  ;;  %v371_v36 = vld [vmem:[#allocation5 + $0x28] sm:$0xff]  ;;  %v372_v38 = vld [vmem:[#allocation5 + $0x30] sm:$0xff]  ;;  %p1583_p10 = pnand %p1582_p9, %p1576_p6 }
  0x78   :  { %1049 = vmatprep.mubr.msk.f32.mxu0 %vm148_vm1, %v138_v3  ;;  %1277 = vmatprep.subr.bf16.mxu1 %v1276_v13  ;;  %v1304_v34 = vpack.c.bf16 %v369_v33, %v368_v31  ;;  %v1308_v37 = vpack.c.bf16 %v371_v36, %v370_v35  ;;  %v373_v39 = vld [vmem:[#allocation5 + $0x38] sm:$0xff]  ;;  %v374_v41 = vld [vmem:[#allocation5 + $0x40] sm:$0xff]  ;;  %v375_v42 = vld [vmem:[#allocation5 + $0x48] sm:$0xff] }
  0x79   :  { %1301 = vmatprep.subr.bf16.mxu0 %v1300_v32  ;;  %v1312_v40 = vpack.c.bf16 %v373_v39, %v372_v38  ;;  %v1316_v43 = vpack.c.bf16 %v375_v42, %v374_v41  ;;  %v376_v44 = vld [vmem:[#allocation5 + $0x50] sm:$0xff]  ;;  %v377_v45 = vld [vmem:[#allocation5 + $0x58] sm:$0xff]  ;;  %v378_v47 = vld [vmem:[#allocation5 + $0x60] sm:$0xff] }
  0x7a   :  { %1303 = vmatpush3.bf16.msra.mxu0 %v1300_v32  ;;  %v1320_v46 = vpack.c.bf16 %v377_v45, %v376_v44  ;;  %v379_v48 = vld [vmem:[#allocation5 + $0x68] sm:$0xff]  ;;  %v919_v50 = vld [vmem:[%s1923_s3] ss:$0 sm:$0xff]  ;;  %v380_v63 = vld [vmem:[#allocation5 + $0x70] sm:$0xff]  ;;  %v1618_v45 = vmov 0.0  }
  0x7b   :  { %1050 = vmatmul.mubr.msk.f32.gmra.mrb[2].mxu0 %vm148_vm1, %v139_v10  ;;  %1279 = vmatpush3.bf16.msra.mxu1 %v1276_v13  ;;  %v1324_v49 = vpack.c.bf16 %v379_v48, %v378_v47  ;;  %v381_v0 = vld [vmem:[#allocation5 + $0x78] sm:$0xff]  ;;  %v478_v2 = vld [vmem:[%s1921_s1] sm:$0xff]  ;;  %v480_v3 = vld [vmem:[%s1921_s1 + $0x10] sm:$0xff]  ;;  %v1616_v10 = vmov 0.0|0.0  }
  0x7c   :  { %1281 = vmatprep.subr.bf16.mxu1 %v1280_v16  ;;  %1305 = vmatprep.subr.bf16.mxu0 %v1304_v34  ;;  %v1328_v1 = vpack.c.bf16 %v381_v0, %v380_v63  ;;  %v520_v5 = vld [vmem:[#allocation7] sm:$0xff]  ;;  %v521_v6 = vld [vmem:[#allocation7 + $0x8] sm:$0xff]  ;;  %v481_v9 = vld [vmem:[%s1921_s1 + $0x18] sm:$0xff] }
  0x7d   :  { %484 = vperm.xlu0 %1441, %v478_v2   ;;  %494 = vperm.xlu1 %1442, %v480_v3   ;;  %v1333_v7 = vpack.c.bf16 %v521_v6, %v520_v5  ;;  %v479_v8 = vld [vmem:[%s1921_s1 + $0x8] sm:$0xff]  ;;  %v925_v11 = vld [vmem:[%s1925_s5] ss:$0 sm:$0xff]  ;;  %v522_v24 = vld [vmem:[#allocation7 + $0x10] sm:$0xff] }
  0x7e   :  { %1307 = vmatpush3.bf16.msra.mxu0 %v1304_v34  ;;  %v524_v27 = vld [vmem:[#allocation7 + $0x20] sm:$0xff]  ;;  %v526_v30 = vld [vmem:[#allocation7 + $0x30] sm:$0xff]  ;;  %v527_v31 = vld [vmem:[#allocation7 + $0x38] sm:$0xff] }
  0x7f   :  { %1283 = vmatpush3.bf16.msra.mxu1 %v1280_v16  ;;  %1309 = vmatprep.subr.bf16.mxu0 %v1308_v37  ;;  %v1342_v32 = vpack.c.bf16 %v527_v31, %v526_v30  ;;  %v528_v33 = vld [vmem:[#allocation7 + $0x40] sm:$0xff]  ;;  %v529_v34 = vld [vmem:[#allocation7 + $0x48] sm:$0xff]  ;;  %v530_v36 = vld [vmem:[#allocation7 + $0x50] sm:$0xff] }
  0x80   :  { %1285 = vmatprep.subr.bf16.mxu1 %v1284_v19  ;;  %v1345_v35 = vpack.c.bf16 %v529_v34, %v528_v33  ;;  %v532_v39 = vld [vmem:[#allocation7 + $0x60] sm:$0xff]  ;;  %v534_v42 = vld [vmem:[#allocation7 + $0x70] sm:$0xff]  ;;  %v620_v47 = vld [vmem:[#allocation8 + $0x8] sm:$0xff] }
  0x81   :  { %489 = vperm.xlu0 %1441, %v479_v8   ;;  %499 = vperm.xlu1 %1442, %v481_v9   ;;  %v621_v48 = vld [vmem:[#allocation8 + $0x10] sm:$0xff]  ;;  %v631_v0 = vld [vmem:[#allocation8 + $0x60] sm:$0xff] }
  0x82   :  { %1311 = vmatpush3.bf16.msra.mxu0 %v1308_v37  ;;  %v531_v37 = vld [vmem:[#allocation7 + $0x58] sm:$0xff]  ;;  %v926_v4 = vld [vmem:[%s1927_s7] ss:$0 sm:$0xff] }
  0x83   :  { %1287 = vmatpush3.bf16.msra.mxu1 %v1284_v19  ;;  %1313 = vmatprep.subr.bf16.mxu0 %v1312_v40  ;;  %v1348_v38 = vpack.c.bf16 %v531_v37, %v530_v36 }
  0x84   :  { %1289 = vmatprep.subr.bf16.mxu1 %v1288_v22 }
  0x86   :  { %1315 = vmatpush3.bf16.msra.mxu0 %v1312_v40  ;;  %v533_v40 = vld [vmem:[#allocation7 + $0x68] sm:$0xff] }
  0x87   :  { %1291 = vmatpush3.bf16.msra.mxu1 %v1288_v22  ;;  %1317 = vmatprep.subr.bf16.mxu0 %v1316_v43  ;;  %v1351_v41 = vpack.c.bf16 %v533_v40, %v532_v39  ;;  %v633_v40 = vld [vmem:[#allocation8 + $0x70] sm:$0xff] }
  0x88   :  { %1293 = vmatprep.subr.bf16.mxu1 %v1292_v25 }
  0x8a   :  { %1319 = vmatpush3.bf16.msra.mxu0 %v1316_v43  ;;  %v535_v43 = vld [vmem:[#allocation7 + $0x78] sm:$0xff] }
  0x8b   :  { %1295 = vmatpush3.bf16.msra.mxu1 %v1292_v25  ;;  %1321 = vmatprep.subr.bf16.mxu0 %v1320_v46  ;;  %v523_v25 = vld [vmem:[#allocation7 + $0x18] sm:$0xff]  ;;  %v1354_v44 = vpack.c.bf16 %v535_v43, %v534_v42  ;;  %v713_v43 = vld [vmem:[#allocation10] sm:$0xff] }
  0x8c   :  { %1297 = vmatprep.subr.bf16.mxu1 %v1296_v28  ;;  %v1336_v26 = vpack.c.bf16 %v523_v25, %v522_v24 }
  0x8e   :  { %1323 = vmatpush3.bf16.msra.mxu0 %v1320_v46  ;;  %v619_v46 = vld [vmem:[#allocation8] sm:$0xff] }
  0x8f   :  { %1299 = vmatpush3.bf16.msra.mxu1 %v1296_v28  ;;  %1325 = vmatprep.subr.bf16.mxu0 %v1324_v49  ;;  %v525_v28 = vld [vmem:[#allocation7 + $0x28] sm:$0xff] }
  0x90   :  { %1332 = vmatprep.subr.bf16.mxu1 %v1616_v10  ;;  %v1339_v29 = vpack.c.bf16 %v525_v28, %v524_v27 }
  0x92   :  { %1327 = vmatpush3.bf16.msra.mxu0 %v1324_v49  ;;  %v1357_v49 = vpack.c.bf16 %v620_v47, %v619_v46  ;;  %v715_v46 = vld [vmem:[#allocation10 + $0x10] sm:$0xff] }
  0x93   :  { %1329 = vmatprep.subr.bf16.mxu0 %v1328_v1 }
  0x96   :  { %1331 = vmatpush3.bf16.msra.mxu0 %v1328_v1  ;;  %v632_v1 = vld [vmem:[#allocation8 + $0x68] sm:$0xff] }
  0x97   :  { %1356 = vmatprep.subr.bf16.mxu0 %v1616_v10  ;;  %v1375_v2 = vpack.c.bf16 %v632_v1, %v631_v0  ;;  %v927_v1 = vld [vmem:[%s1929_s9] ss:$0 sm:$0xff] }
  0xfc   :  { %v485_v3 = vpop.permute.xlu0 %484  ;;  %v495_v8 = vpop.permute.xlu1 %494 }
 0x14a   :  { %v1048_v51 = vpop.f32.mrb[0].mxu0 }
 0x14b   :  { %v237_v52 = vadd.f32 %v1048_v51, %v919_v50  ;;  %v231_v53 = vpop.f32.mrb[1].mxu0 }
 0x14c   :  { %v232_v54 = vadd.f32 %v919_v50, %v231_v53  ;;  %v624_v53 = vld [vmem:[#allocation8 + $0x28] sm:$0xff] }
 0x14d   :  { %v251_v57 = vmax.f32 %v237_v52, 0.0  ;;  %v623_v52 = vld [vmem:[#allocation8 + $0x20] sm:$0xff] }
 0x14e   :  { %v1051_v55 = vpop.f32.mrb[2].mxu0  ;;  %v250_v56 = vmax.f32 %v232_v54, 0.0  ;;  %v1363_v54 = vpack.c.bf16 %v624_v53, %v623_v52  ;;  %v719_v53 = vld [vmem:[#allocation10 + $0x30] sm:$0xff] }
 0x14f   :  { %v247_v58 = vadd.f32 %v1051_v55, %v919_v50  ;;  %v241_v59 = vpop.f32.mrb[3].mxu0  ;;  %v625_v55 = vld [vmem:[#allocation8 + $0x30] sm:$0xff] }
 0x150   :  { %v242_v60 = vadd.f32 %v919_v50, %v241_v59  ;;  %1084 = vmatprep.mubr.f32.mxu1 %v250_v56  ;;  %v622_v50 = vld [vmem:[#allocation8 + $0x18] sm:$0xff]  ;;  %v628_v59 = vld [vmem:[#allocation8 + $0x48] sm:$0xff] }
 0x151   :  { %1085 = vmatmul.mubr.f32.vlgmr.msra.gmra.mrb[0].mxu1 %v251_v57  ;;  %v253_v62 = vmax.f32 %v247_v58, 0.0  ;;  %v1360_v51 = vpack.c.bf16 %v622_v50, %v621_v48  ;;  %v626_v56 = vld [vmem:[#allocation8 + $0x38] sm:$0xff]  ;;  %v627_v58 = vld [vmem:[#allocation8 + $0x40] sm:$0xff] }
 0x152   :  { %v252_v61 = vmax.f32 %v242_v60, 0.0  ;;  %1334 = vmatpush3.bf16.msra.mxu1 %v1333_v7  ;;  %v1366_v57 = vpack.c.bf16 %v626_v56, %v625_v55  ;;  %v1369_v60 = vpack.c.bf16 %v628_v59, %v627_v58  ;;  %v716_v48 = vld [vmem:[#allocation10 + $0x18] sm:$0xff]  ;;  %v717_v50 = vld [vmem:[#allocation10 + $0x20] sm:$0xff]  ;;  %v723_v59 = vld [vmem:[#allocation10 + $0x50] sm:$0xff] }
 0x153   :  { %1335 = vmatprep.subr.bf16.mxu1 %v1616_v10  ;;  %v721_v56 = vld [vmem:[#allocation10 + $0x40] sm:$0xff] }
 0x154   :  { %1087 = vmatprep.mubr.f32.mxu1 %v252_v61  ;;  %v629_v61 = vld [vmem:[#allocation8 + $0x50] sm:$0xff] }
 0x155   :  { %1088 = vmatmul.mubr.f32.gmra.mrb[2].mxu1 %v253_v62  ;;  %v630_v62 = vld [vmem:[#allocation8 + $0x58] sm:$0xff] }
 0x156   :  { %1337 = vmatpush3.bf16.msra.mxu1 %v1336_v26  ;;  %1160 = vmatprep.mubr.msk.f32.mxu1 %vm1617_vm2, %v1618_v45  ;;  %v1372_v63 = vpack.c.bf16 %v630_v62, %v629_v61  ;;  %v725_v62 = vld [vmem:[#allocation10 + $0x60] sm:$0xff] }
 0x157   :  { %1338 = vmatprep.subr.bf16.mxu1 %v1616_v10 }
 0x15a   :  { %1340 = vmatpush3.bf16.msra.mxu1 %v1339_v29 }
 0x15b   :  { %1341 = vmatprep.subr.bf16.mxu1 %v1616_v10 }
 0x15e   :  { %1343 = vmatpush3.bf16.msra.mxu1 %v1342_v32 }
 0x15f   :  { %1344 = vmatprep.subr.bf16.mxu1 %v1616_v10 }
 0x162   :  { %1346 = vmatpush3.bf16.msra.mxu1 %v1345_v35 }
 0x163   :  { %1347 = vmatprep.subr.bf16.mxu1 %v1616_v10 }
 0x166   :  { %1349 = vmatpush3.bf16.msra.mxu1 %v1348_v38 }
 0x167   :  { %1350 = vmatprep.subr.bf16.mxu1 %v1616_v10 }
 0x16a   :  { %1352 = vmatpush3.bf16.msra.mxu1 %v1351_v41  ;;  %v634_v41 = vld [vmem:[#allocation8 + $0x78] sm:$0xff] }
 0x16b   :  { %1353 = vmatprep.subr.bf16.mxu1 %v1616_v10  ;;  %v1378_v42 = vpack.c.bf16 %v634_v41, %v633_v40 }
 0x16e   :  { %1355 = vmatpush3.bf16.msra.mxu1 %v1354_v44  ;;  %v714_v44 = vld [vmem:[#allocation10 + $0x8] sm:$0xff] }
 0x16f   :  { %1380 = vmatprep.subr.bf16.mxu1 %v1616_v10  ;;  %v1381_v47 = vpack.c.bf16 %v714_v44, %v713_v43 }
 0x224   :  { %v1086_v12 = vpop.f32.mrb[0].mxu1 }
 0x225   :  { %v349_v13 = vadd.f32 %v1086_v12, %v925_v11  ;;  %v343_v14 = vpop.f32.mrb[1].mxu1 }
 0x226   :  { %v344_v15 = vadd.f32 %v925_v11, %v343_v14 }
 0x227   :  { %v363_v18 = vmax.f32 %v349_v13, 0.0 }
 0x228   :  { %v362_v16 = vmax.f32 %v344_v15, 0.0  ;;  %v1089_v17 = vpop.f32.mrb[2].mxu1 }
 0x229   :  { %v359_v19 = vadd.f32 %v1089_v17, %v925_v11  ;;  %v353_v20 = vpop.f32.mrb[3].mxu1 }
 0x22a   :  { %v354_v21 = vadd.f32 %v925_v11, %v353_v20  ;;  %1122 = vmatprep.mubr.f32.mxu0 %v362_v16  ;;  %v490_v11 = vpop.permute.xlu0 %489 }
 0x22b   :  { %1123 = vmatmul.mubr.f32.vlgmr.msra.gmra.mrb[4].mxu0 %v363_v18  ;;  %v365_v23 = vmax.f32 %v359_v19, 0.0 }
 0x22c   :  { %v364_v22 = vmax.f32 %v354_v21, 0.0  ;;  %1358 = vmatpush3.bf16.msra.mxu0 %v1357_v49  ;;  %v1384_v49 = vpack.c.bf16 %v716_v48, %v715_v46 }
 0x22d   :  { %1359 = vmatprep.subr.bf16.mxu0 %v1616_v10 }
 0x22e   :  { %1125 = vmatprep.mubr.f32.mxu0 %v364_v22  ;;  %v500_v22 = vpop.permute.xlu1 %499 }
 0x22f   :  { %1126 = vmatmul.mubr.f32.gmra.mrb[6].mxu0 %v365_v23 }
 0x230   :  { %1195 = vmatprep.mubr.msk.f32.mxu0 %vm1617_vm2, %v1618_v45  ;;  %1361 = vmatpush3.bf16.msra.mxu0 %v1360_v51  ;;  %v718_v51 = vld [vmem:[#allocation10 + $0x28] sm:$0xff] }
 0x231   :  { %1362 = vmatprep.subr.bf16.mxu0 %v1616_v10  ;;  %v1387_v52 = vpack.c.bf16 %v718_v51, %v717_v50 }
 0x234   :  { %1364 = vmatpush3.bf16.msra.mxu0 %v1363_v54  ;;  %v720_v54 = vld [vmem:[#allocation10 + $0x38] sm:$0xff] }
 0x235   :  { %1365 = vmatprep.subr.bf16.mxu0 %v1616_v10  ;;  %v1390_v55 = vpack.c.bf16 %v720_v54, %v719_v53 }
 0x238   :  { %1367 = vmatpush3.bf16.msra.mxu0 %v1366_v57  ;;  %v722_v57 = vld [vmem:[#allocation10 + $0x48] sm:$0xff] }
 0x239   :  { %1368 = vmatprep.subr.bf16.mxu0 %v1616_v10  ;;  %v1393_v58 = vpack.c.bf16 %v722_v57, %v721_v56 }
 0x23c   :  { %1370 = vmatpush3.bf16.msra.mxu0 %v1369_v60  ;;  %v724_v60 = vld [vmem:[#allocation10 + $0x58] sm:$0xff] }
 0x23d   :  { %1371 = vmatprep.subr.bf16.mxu0 %v1616_v10  ;;  %v1396_v61 = vpack.c.bf16 %v724_v60, %v723_v59 }
 0x240   :  { %1373 = vmatpush3.bf16.msra.mxu0 %v1372_v63  ;;  %v726_v63 = vld [vmem:[#allocation10 + $0x68] sm:$0xff] }
 0x241   :  { %1374 = vmatprep.subr.bf16.mxu0 %v1616_v10  ;;  %v1399_v0 = vpack.c.bf16 %v726_v63, %v725_v62 }
 0x244   :  { %1376 = vmatpush3.bf16.msra.mxu0 %v1375_v2 }
 0x245   :  { %1377 = vmatprep.subr.bf16.mxu0 %v1616_v10 }
 0x248   :  { %1379 = vmatpush3.bf16.msra.mxu0 %v1378_v42  ;;  %v930_v42 = vld [vmem:[%s1935_s15] ss:$0 sm:$0xff] }
 0x249   :  { %1404 = vmatprep.subr.bf16.mxu0 %v1616_v10 }
 0x2fe   :  { %v1124_v5 = vpop.f32.mrb[4].mxu0 }
 0x2ff   :  { %v461_v6 = vadd.f32 %v1124_v5, %v926_v4  ;;  %v455_v7 = vpop.f32.mrb[5].mxu0 }
 0x300   :  { %v456_v9 = vadd.f32 %v926_v4, %v455_v7  ;;  %v728_v7 = vld [vmem:[#allocation10 + $0x78] sm:$0xff] }
 0x301   :  { %v475_v12 = vmax.f32 %v461_v6, 0.0  ;;  %v727_v6 = vld [vmem:[#allocation10 + $0x70] sm:$0xff] }
 0x302   :  { %v474_v13 = vmax.f32 %v456_v9, 0.0  ;;  %v1127_v14 = vpop.f32.mrb[6].mxu0  ;;  %v807_v9 = vld [vmem:[#allocation11] sm:$0xff] }
 0x303   :  { %v503_v15 = vmul.f32 %v490_v11, %v475_v12  ;;  %v471_v16 = vadd.f32 %v1127_v14, %v926_v4  ;;  %v465_v17 = vpop.f32.mrb[7].mxu0  ;;  %v808_v11 = vld [vmem:[#allocation11 + $0x8] sm:$0xff]  ;;  %v809_v12 = vld [vmem:[#allocation11 + $0x10] sm:$0xff]  ;;  %v810_v14 = vld [vmem:[#allocation11 + $0x18] sm:$0xff] }
 0x304   :  { %v502_v18 = vmul.f32 %v485_v3, %v474_v13  ;;  %v466_v19 = vadd.f32 %v926_v4, %v465_v17  ;;  %v1405_v13 = vpack.c.bf16 %v808_v11, %v807_v9  ;;  %v812_v17 = vld [vmem:[#allocation11 + $0x28] sm:$0xff] }
 0x305   :  { %v477_v20 = vmax.f32 %v471_v16, 0.0  ;;  %v811_v16 = vld [vmem:[#allocation11 + $0x20] sm:$0xff] }
 0x306   :  { %v506_v21 = vadd.f32 %v503_v15, %v502_v18  ;;  %v476_v23 = vmax.f32 %v466_v19, 0.0  ;;  %v1408_v15 = vpack.c.bf16 %v810_v14, %v809_v12  ;;  %v1411_v18 = vpack.c.bf16 %v812_v17, %v811_v16  ;;  %v814_v19 = vld [vmem:[#allocation11 + $0x38] sm:$0xff] }
 0x307   :  { %v505_v24 = vmul.f32 %v500_v22, %v477_v20  ;;  %v816_v22 = vld [vmem:[#allocation11 + $0x48] sm:$0xff] }
 0x308   :  { %v507_v25 = vrot.slane %v506_v21, 4  ;;  %v504_v26 = vmul.f32 %v495_v8, %v476_v23  ;;  %v1402_v8 = vpack.c.bf16 %v728_v7, %v727_v6 }
 0x30a   :  { %v508_v27 = vadd.f32 %v507_v25, %v506_v21  ;;  %v513_v28 = vadd.f32 %v505_v24, %v504_v26  ;;  %v815_v21 = vld [vmem:[#allocation11 + $0x40] sm:$0xff]  ;;  %v817_v24 = vld [vmem:[#allocation11 + $0x50] sm:$0xff]  ;;  %v818_v25 = vld [vmem:[#allocation11 + $0x58] sm:$0xff] }
 0x30b   :  { %v1417_v23 = vpack.c.bf16 %v816_v22, %v815_v21  ;;  %v1420_v26 = vpack.c.bf16 %v818_v25, %v817_v24 }
 0x30c   :  { %v509_v29 = vrot.slane %v508_v27, 2  ;;  %v514_v30 = vrot.slane %v513_v28, 4 }
 0x30e   :  { %v510_v31 = vadd.f32 %v509_v29, %v508_v27  ;;  %v515_v32 = vadd.f32 %v514_v30, %v513_v28  ;;  %v819_v27 = vld [vmem:[#allocation11 + $0x60] sm:$0xff]  ;;  %v820_v28 = vld [vmem:[#allocation11 + $0x68] sm:$0xff] }
 0x30f   :  { %v1423_v29 = vpack.c.bf16 %v820_v28, %v819_v27  ;;  %v928_v30 = vld [vmem:[%s1931_s11] ss:$0 sm:$0xff] }
 0x310   :  { %v516_v33 = vrot.slane %v515_v32, 2  ;;  %v511_v34 = vrot.slane %v510_v31, 1 }
 0x312   :  { %v517_v35 = vadd.f32 %v516_v33, %v515_v32  ;;  %v512_v37 = vadd.f32 %v511_v34, %v510_v31 }
 0x314   :  { %v518_v36 = vrot.slane %v517_v35, 1 }
 0x316   :  { %v519_v38 = vadd.f32 %v518_v36, %v517_v35  ;;  %v821_v35 = vld [vmem:[#allocation11 + $0x70] sm:$0xff]  ;;  %v822_v36 = vld [vmem:[#allocation11 + $0x78] sm:$0xff] }
 0x318   :  { %v546_v39 = vsel %vm545_vm3, %v519_v38, %v512_v37  ;;  %v1426_v37 = vpack.c.bf16 %v822_v36, %v821_v35  ;;  %v929_v38 = vld [vmem:[%s1933_s13] ss:$0 sm:$0xff] }
 0x319   :  { %1161 = vmatmul.mubr.f32.vlgmr.msra.gmra.mrb[4].mxu1 %v546_v39 }
 0x31a   :  { %1230 = vmatprep.mubr.msk.f32.mxu1 %vm1617_vm2, %v1618_v45  ;;  %1382 = vmatpush3.bf16.msra.mxu1 %v1381_v47 }
 0x31b   :  { %1383 = vmatprep.subr.bf16.mxu1 %v1616_v10 }
 0x31e   :  { %1385 = vmatpush3.bf16.msra.mxu1 %v1384_v49 }
 0x31f   :  { %1386 = vmatprep.subr.bf16.mxu1 %v1616_v10 }
 0x322   :  { %1388 = vmatpush3.bf16.msra.mxu1 %v1387_v52 }
 0x323   :  { %1389 = vmatprep.subr.bf16.mxu1 %v1616_v10 }
 0x326   :  { %1391 = vmatpush3.bf16.msra.mxu1 %v1390_v55 }
 0x327   :  { %1392 = vmatprep.subr.bf16.mxu1 %v1616_v10 }
 0x32a   :  { %1394 = vmatpush3.bf16.msra.mxu1 %v1393_v58 }
 0x32b   :  { %1395 = vmatprep.subr.bf16.mxu1 %v1616_v10 }
 0x32e   :  { %1397 = vmatpush3.bf16.msra.mxu1 %v1396_v61 }
 0x32f   :  { %1398 = vmatprep.subr.bf16.mxu1 %v1616_v10 }
 0x332   :  { %1400 = vmatpush3.bf16.msra.mxu1 %v1399_v0 }
 0x333   :  { %1401 = vmatprep.subr.bf16.mxu1 %v1616_v10 }
 0x336   :  { %1403 = vmatpush3.bf16.msra.mxu1 %v1402_v8 }
 0x3ec   :  { %v614_v2 = vpop.f32.mrb[4].mxu1 }
 0x3ed   :  { %v615_v3 = vadd.f32 %v927_v1, %v614_v2  ;;  %v1162_v4 = vpop.f32.mrb[5].mxu1 }
 0x3ef   :  { %v618_v5 = vmax.f32 %v615_v3, 0.0 }
 0x3f1   :  { %1196 = vmatmul.mubr.f32.vlgmr.msra.gmra.mrb[8].mxu0 %v618_v5 }
 0x3f2   :  { %1265 = vmatprep.mubr.msk.f32.mxu0 %vm1617_vm2, %v1618_v45  ;;  %1406 = vmatpush3.bf16.msra.mxu0 %v1405_v13  ;;  %v813_v45 = vld [vmem:[#allocation11 + $0x30] sm:$0xff] }
 0x3f3   :  { %1407 = vmatprep.subr.bf16.mxu0 %v1616_v10  ;;  %v1414_v20 = vpack.c.bf16 %v814_v19, %v813_v45 }
 0x3f6   :  { %1409 = vmatpush3.bf16.msra.mxu0 %v1408_v15 }
 0x3f7   :  { %1410 = vmatprep.subr.bf16.mxu0 %v1616_v10 }
 0x3fa   :  { %1412 = vmatpush3.bf16.msra.mxu0 %v1411_v18 }
 0x3fb   :  { %1413 = vmatprep.subr.bf16.mxu0 %v1616_v10 }
 0x3fe   :  { %1415 = vmatpush3.bf16.msra.mxu0 %v1414_v20 }
 0x3ff   :  { %1416 = vmatprep.subr.bf16.mxu0 %v1616_v10 }
 0x402   :  { %1418 = vmatpush3.bf16.msra.mxu0 %v1417_v23 }
 0x403   :  { %1419 = vmatprep.subr.bf16.mxu0 %v1616_v10 }
 0x406   :  { %1421 = vmatpush3.bf16.msra.mxu0 %v1420_v26 }
 0x407   :  { %1422 = vmatprep.subr.bf16.mxu0 %v1616_v10 }
 0x40a   :  { %1424 = vmatpush3.bf16.msra.mxu0 %v1423_v29 }
 0x40b   :  { %1425 = vmatprep.subr.bf16.mxu0 %v1616_v10 }
 0x40e   :  { %1427 = vmatpush3.bf16.msra.mxu0 %v1426_v37 }
 0x4c4   :  { %v708_v31 = vpop.f32.mrb[8].mxu0 }
 0x4c5   :  { %v709_v32 = vadd.f32 %v928_v30, %v708_v31  ;;  %v1197_v33 = vpop.f32.mrb[9].mxu0 }
 0x4c7   :  { %v712_v34 = vmax.f32 %v709_v32, 0.0 }
 0x4c9   :  { %1231 = vmatmul.mubr.f32.vlgmr.msra.gmra.mrb[6].mxu1 %v712_v34 }
 0x59c   :  { %v802_v39 = vpop.f32.mrb[6].mxu1 }
 0x59d   :  { %v803_v40 = vadd.f32 %v929_v38, %v802_v39  ;;  %v1232_v10 = vpop.f32.mrb[7].mxu1 }
 0x59f   :  { %v806_v41 = vmax.f32 %v803_v40, 0.0 }
 0x5a1   :  { %1266 = vmatmul.mubr.f32.vlgmr.msra.gmra.mrb[10].mxu0 %v806_v41 }
 0x674   :  { %v896_v43 = vpop.f32.mrb[10].mxu0 }
 0x675   :  { %v897_v44 = vadd.f32 %v930_v42, %v896_v43  ;;  %v1267_v46 = vpop.f32.mrb[11].mxu0 }
 0x677   :  { %900 = vst [vmem:[#allocation13] sm:$0x3] %v897_v44 }
 0x678   :  { %1586 = shalt.err (!%p1583_p10)
}
 0x679   :  { %s1587_s2 = scalar_lea.hbm %s1936_s16, 32 }
 0x67a   :  { %p1588_p11 = scmp.ne.s32.totalorder %s1936_s16, %s1587_s2  ;;  %p1591_p12 = scmp.lt.u32.totalorder %s1587_s2, %s1936_s16 }
 0x67c   :  { %p1593_p13 = pnand %p1591_p12, %p1588_p11 }
 0x67e   :  { %1596 = shalt.err (!%p1593_p13)
}
 0x67f   :  { %910 = dma.vmem_to_hbm [thread:$0]  %s908_s14, 32, %s1936_s16, [#allocation4]  }
 0x680   :  { %1605 = dma.done.wait [#allocation4], 32  }
 0x681   :  { %1606 = vsyncadd [#allocation4], 4294967264 }
 0x682   :  { %914 = vsyncpa [#allocation3], 1 }
 0x683   :  { %915 = vsyncpa [#allocation6], 1 }
 0x684   :  { %916 = vsyncpa [#allocation9], 1 }
 0x685   :  { %917 = vsyncpa [#allocation12], 1 }
 0x686   :  { %918 = vsyncpa [#allocation4], 1 }

</bundles_post_ra>
